<compile_context>
chip_gen: v6e
topology: v6e:2x2x1
jax: 0.10.0
libtpu: 0.0.40
codegen_flags: <defaults>
</compile_context>

<pallas_src>
import functools

import jax
import jax.numpy as jnp
from jax.experimental import pallas as pl
from jax.experimental.pallas import tpu as pltpu


def _round_up(x, m):
    return (x + m - 1) // m * m


def _mlp_kernel(x_ref, w12_ref, w3_ref, o_ref, acc_ref, *, th):
    # Grid = (token tiles, hidden tiles); hidden (reduction) axis is last.
    #   x_ref:   (tm, n_embd)
    #   w12_ref: (n_embd, 2*th)   [first th cols = w_fc tile, last th = w_fc2 tile]
    #   w3_ref:  (th, n_embd)
    #   o_ref:   (tm, n_embd)
    #   acc_ref: (tm, n_embd) f32 accumulator (persists across hidden tiles)
    h_idx = pl.program_id(1)

    @pl.when(h_idx == 0)
    def _():
        acc_ref[...] = jnp.zeros_like(acc_ref)

    x = x_ref[...]
    # One fused MXU matmul for gate + up projections of this hidden tile.
    h12 = jnp.dot(x, w12_ref[...], preferred_element_type=jnp.float32)
    h1 = h12[:, :th]
    h2 = h12[:, th:]
    # SwiGLU gate in f32: h1 * silu(h2)
    gated = h1 * (h2 * jax.nn.sigmoid(h2))
    acc_ref[...] += jnp.dot(
        gated.astype(w3_ref.dtype), w3_ref[...],
        preferred_element_type=jnp.float32)

    @pl.when(h_idx == pl.num_programs(1) - 1)
    def _():
        o_ref[...] = acc_ref[...].astype(o_ref.dtype)


def mlp_pallas(x, w_fc, w_fc2, w_proj, *, tm=256, th=512,
               compute_dtype=None, out_dtype=None,
               vmem_limit_bytes=48 * 1024 * 1024):
    """x: (..., n_embd); weights in PyTorch nn.Linear layout (out, in).

    tm: token tile (rows fed to the MXU per step).  th: hidden tile.
    compute_dtype: dtype fed to the MXU (e.g. jnp.bfloat16); accumulation is
    always f32 and the SwiGLU gate is computed in f32.
    """
    orig_dtype = x.dtype
    if compute_dtype is None:
        compute_dtype = orig_dtype
    if out_dtype is None:
        out_dtype = orig_dtype

    n_embd = x.shape[-1]
    hidden = w_fc.shape[0]
    lead_shape = x.shape[:-1]

    x2d = x.reshape(-1, n_embd).astype(compute_dtype)
    M = x2d.shape[0]

    # Clamp & align tiles (sublane-friendly: multiples of 16 / 128).
    tm_eff = _round_up(min(tm, _round_up(max(M, 1), 16)), 16)
    th_eff = _round_up(min(th, _round_up(hidden, 128)), 128)

    M_pad = _round_up(M, tm_eff)
    H_pad = _round_up(hidden, th_eff)
    if M_pad != M:
        x2d = jnp.pad(x2d, ((0, M_pad - M), (0, 0)))

    # (in, out) layouts; zero-pad hidden so it tiles evenly (silu(0)=0 and the
    # padded w_proj rows are zero, so padding contributes nothing).
    w1 = w_fc.T.astype(compute_dtype)     # (n_embd, hidden)
    w2 = w_fc2.T.astype(compute_dtype)    # (n_embd, hidden)
    w3 = w_proj.T.astype(compute_dtype)   # (hidden, n_embd)
    if H_pad != hidden:
        w1 = jnp.pad(w1, ((0, 0), (0, H_pad - hidden)))
        w2 = jnp.pad(w2, ((0, 0), (0, H_pad - hidden)))
        w3 = jnp.pad(w3, ((0, H_pad - hidden), (0, 0)))
    n_h = H_pad // th_eff

    # Fuse gate/up weights: per hidden tile h, columns [0:th] are the w_fc
    # tile and [th:2*th] are the w_fc2 tile -> one (n_embd, 2*th) block.
    w12 = jnp.concatenate(
        [w1.reshape(n_embd, n_h, th_eff), w2.reshape(n_embd, n_h, th_eff)],
        axis=-1).reshape(n_embd, n_h * 2 * th_eff)

    out2d = pl.pallas_call(
        functools.partial(_mlp_kernel, th=th_eff),
        out_shape=jax.ShapeDtypeStruct((M_pad, n_embd), out_dtype),
        grid_spec=pltpu.PrefetchScalarGridSpec(
            num_scalar_prefetch=0,
            grid=(M_pad // tm_eff, n_h),
            in_specs=[
                pl.BlockSpec((tm_eff, n_embd), lambda i, h: (i, 0)),
                pl.BlockSpec((n_embd, 2 * th_eff), lambda i, h: (0, h)),
                pl.BlockSpec((th_eff, n_embd), lambda i, h: (h, 0)),
            ],
            out_specs=pl.BlockSpec((tm_eff, n_embd), lambda i, h: (i, 0)),
            scratch_shapes=[pltpu.VMEM((tm_eff, n_embd), jnp.float32)],
        ),
        compiler_params=pltpu.CompilerParams(
            dimension_semantics=("parallel", "arbitrary"),
            vmem_limit_bytes=vmem_limit_bytes,
        ),
    )(x2d, w12, w3)

    if M_pad != M:
        out2d = out2d[:M]
    return out2d.reshape(*lead_shape, n_embd)


def _ref_mlp(x, w_fc, w_fc2, w_proj):
    x1 = x @ w_fc.T
    x2 = x @ w_fc2.T
    x2 = x2 * jax.nn.sigmoid(x2)
    return (x1 * x2) @ w_proj.T


if __name__ == "__main__":
    # Config consistent with the module's __init__:
    #   n_embd=256, ffn_dim_multiplier=None, multiple_of=256
    #   hidden = int(2 * (4*256) / 3) = 682 -> rounded up to 768
    n_embd = 256
    multiple_of = 256
    hidden = 4 * n_embd
    hidden = int(2 * hidden / 3)
    hidden = multiple_of * ((hidden + multiple_of - 1) // multiple_of)  # 768

    B, T = 2, 8
    key = jax.random.PRNGKey(0)
    kx, k1, k2, k3 = jax.random.split(key, 4)

    x = jax.random.normal(kx, (B, T, n_embd), dtype=jnp.float32)
    # nn.Linear default init: U(-1/sqrt(in), 1/sqrt(in)), deterministic here.
    bound1 = 1.0 / (n_embd ** 0.5)
    bound3 = 1.0 / (hidden ** 0.5)
    w_fc = jax.random.uniform(k1, (hidden, n_embd), jnp.float32, -bound1, bound1)
    w_fc2 = jax.random.uniform(k2, (hidden, n_embd), jnp.float32, -bound1, bound1)
    w_proj = jax.random.uniform(k3, (n_embd, hidden), jnp.float32, -bound3, bound3)

    ref = _ref_mlp(x, w_fc, w_fc2, w_proj)

    # f32 path (tm clamps from 256 to 16 for this tiny M; hidden streamed in
    # th=256 tiles -> exercises the reduction axis / accumulator).
    out = mlp_pallas(x, w_fc, w_fc2, w_proj, tm=256, th=256)
    out = jax.block_until_ready(out)
    assert out.shape == (B, T, n_embd)
    assert jnp.allclose(out, ref, atol=1e-3, rtol=1e-3), "f32 mismatch vs reference"

    # bf16 MXU path (f32 accumulation / gating inside the kernel).
    out_bf16 = mlp_pallas(x, w_fc, w_fc2, w_proj, tm=256, th=256,
                          compute_dtype=jnp.bfloat16, out_dtype=jnp.float32)
    out_bf16 = jax.block_until_ready(out_bf16)
    rel = jnp.linalg.norm(out_bf16 - ref) / jnp.linalg.norm(ref)
    assert rel < 5e-2, f"bf16 path relative error too large: {rel}"

    print("KERNEL_OK")
</pallas_src>

<mosaic_0001>
module attributes {stable_mosaic.version = 11 : i64} {
  func.func @_mlp_kernel(%arg0: i32, %arg1: i32, %arg2: memref<16x256xf32, #tpu.memory_space<vmem>>, %arg3: memref<256x512xf32, #tpu.memory_space<vmem>>, %arg4: memref<256x256xf32, #tpu.memory_space<vmem>>, %arg5: memref<16x256xf32, #tpu.memory_space<vmem>>, %arg6: memref<16x256xf32, #tpu.memory_space<vmem>>) attributes {dimension_semantics = [#tpu.dimension_semantics<parallel>, #tpu.dimension_semantics<arbitrary>], iteration_bounds = array<i64: 1, 3>, scalar_prefetch = 0 : i64, scratch_operands = 1 : i64, tpu.core_type = #tpu.core_type<tc>, window_params = [{transform_indices = @transform_0, window_bounds = array<i64: 16, 256>}, {transform_indices = @transform_1, window_bounds = array<i64: 256, 512>}, {transform_indices = @transform_2, window_bounds = array<i64: 256, 256>}, {transform_indices = @transform_3, window_bounds = array<i64: 16, 256>}]} {
    %c0_i32 = arith.constant 0 : i32
    %0 = arith.cmpi eq, %arg1, %c0_i32 : i32
    %1 = arith.extui %0 : i1 to i32
    %c0_i32_0 = arith.constant 0 : i32
    %2 = arith.cmpi ne, %1, %c0_i32_0 : i32
    scf.if %2 {
      %cst_13 = arith.constant 0.000000e+00 : f32
      %23 = vector.broadcast %cst_13 : f32 to vector<16x256xf32>
      %c0_14 = arith.constant 0 : index
      %c0_15 = arith.constant 0 : index
      %24 = vector.load %arg6[%c0_14, %c0_15] : memref<16x256xf32, #tpu.memory_space<vmem>>, vector<16x256xf32>
      tpu.vector_store %arg6[%c0_14, %c0_15], %23 {strides = array<i32>} : memref<16x256xf32, #tpu.memory_space<vmem>>, vector<16x256xf32>,
    } else {
    }
    %c0 = arith.constant 0 : index
    %c0_1 = arith.constant 0 : index
    %3 = vector.load %arg2[%c0, %c0_1] : memref<16x256xf32, #tpu.memory_space<vmem>>, vector<16x256xf32>
    %c0_2 = arith.constant 0 : index
    %c0_3 = arith.constant 0 : index
    %4 = vector.load %arg3[%c0_2, %c0_3] : memref<256x512xf32, #tpu.memory_space<vmem>>, vector<256x512xf32>
    %cst = arith.constant dense<0.000000e+00> : vector<16x512xf32>
    %5 = tpu.matmul %3, %4, %cst {dimension_numbers = #tpu.dot_dimension_numbers<[1], [0], [0], [1], [0, 0, 1, 1], [], []>} : vector<16x256xf32>, vector<256x512xf32>, vector<16x512xf32> -> vector<16x512xf32>
    %6 = vector.extract_strided_slice %5 {offsets = [0, 0], sizes = [16, 256], strides = [1, 1]} : vector<16x512xf32> to vector<16x256xf32>
    %7 = vector.extract_strided_slice %5 {offsets = [0, 256], sizes = [16, 256], strides = [1, 1]} : vector<16x512xf32> to vector<16x256xf32>
    %8 = arith.negf %7 : vector<16x256xf32>
    %9 = math.exp %8 : vector<16x256xf32>
    %cst_4 = arith.constant 1.000000e+00 : f32
    %10 = vector.broadcast %cst_4 : f32 to vector<16x256xf32>
    %11 = arith.addf %10, %9 : vector<16x256xf32>
    %12 = arith.divf %10, %11 : vector<16x256xf32>
    %13 = arith.mulf %7, %12 : vector<16x256xf32>
    %14 = arith.mulf %6, %13 : vector<16x256xf32>
    %c0_5 = arith.constant 0 : index
    %c0_6 = arith.constant 0 : index
    %15 = vector.load %arg6[%c0_5, %c0_6] : memref<16x256xf32, #tpu.memory_space<vmem>>, vector<16x256xf32>
    %c0_7 = arith.constant 0 : index
    %c0_8 = arith.constant 0 : index
    %16 = vector.load %arg4[%c0_7, %c0_8] : memref<256x256xf32, #tpu.memory_space<vmem>>, vector<256x256xf32>
    %cst_9 = arith.constant dense<0.000000e+00> : vector<16x256xf32>
    %17 = tpu.matmul %14, %16, %cst_9 {dimension_numbers = #tpu.dot_dimension_numbers<[1], [0], [0], [1], [0, 0, 1, 1], [], []>} : vector<16x256xf32>, vector<256x256xf32>, vector<16x256xf32> -> vector<16x256xf32>
    %18 = arith.addf %15, %17 : vector<16x256xf32>
    %c0_10 = arith.constant 0 : index
    %c0_11 = arith.constant 0 : index
    %19 = vector.load %arg6[%c0_10, %c0_11] : memref<16x256xf32, #tpu.memory_space<vmem>>, vector<16x256xf32>
    tpu.vector_store %arg6[%c0_10, %c0_11], %18 {strides = array<i32>} : memref<16x256xf32, #tpu.memory_space<vmem>>, vector<16x256xf32>,
    %c2_i32 = arith.constant 2 : i32
    %20 = arith.cmpi eq, %arg1, %c2_i32 : i32
    %21 = arith.extui %20 : i1 to i32
    %c0_i32_12 = arith.constant 0 : i32
    %22 = arith.cmpi ne, %21, %c0_i32_12 : i32
    scf.if %22 {
      %c0_13 = arith.constant 0 : index
      %c0_14 = arith.constant 0 : index
      %23 = vector.load %arg6[%c0_13, %c0_14] : memref<16x256xf32, #tpu.memory_space<vmem>>, vector<16x256xf32>
      %c0_15 = arith.constant 0 : index
      %c0_16 = arith.constant 0 : index
      %24 = vector.load %arg5[%c0_15, %c0_16] : memref<16x256xf32, #tpu.memory_space<vmem>>, vector<16x256xf32>
      tpu.vector_store %arg5[%c0_15, %c0_16], %23 {strides = array<i32>} : memref<16x256xf32, #tpu.memory_space<vmem>>, vector<16x256xf32>,
    } else {
    }
    return
  }
  func.func @transform_0(%arg0: i32, %arg1: i32) -> (i32, i32) {
    %c0_i32 = arith.constant 0 : i32
    %c0_i32_0 = arith.constant 0 : i32
    return %arg0, %c0_i32 : i32, i32
  }
  func.func @transform_1(%arg0: i32, %arg1: i32) -> (i32, i32) {
    %c0_i32 = arith.constant 0 : i32
    %c0_i32_0 = arith.constant 0 : i32
    return %c0_i32, %arg1 : i32, i32
  }
  func.func @transform_2(%arg0: i32, %arg1: i32) -> (i32, i32) {
    %c0_i32 = arith.constant 0 : i32
    %c0_i32_0 = arith.constant 0 : i32
    return %arg1, %c0_i32 : i32, i32
  }
  func.func @transform_3(%arg0: i32, %arg1: i32) -> (i32, i32) {
    %c0_i32 = arith.constant 0 : i32
    %c0_i32_0 = arith.constant 0 : i32
    return %arg0, %c0_i32 : i32, i32
  }
}

</mosaic_0001>

<bundles_post_ra>
// kernel: tpu_custom_call.1
= control target key start
LH: loop header
LB: loop body
LE: loop exit
PB: predicated region body
PF: predicated region fallthrough
CT: control target
= control target key end

     0   :  { %8 = vsyncpa [#allocation4], 0  ;;  %s1614_s0 = inlined_call_operand.hbm [shape: f32[16,256], index: 0, kind: input, shape index: {}]   ;;  %s1615_s1 = inlined_call_operand.hbm [shape: f32[256,1536], index: 1, kind: input, shape index: {}]   ;;  %s1616_s2 = inlined_call_operand.hbm [shape: f32[768,256], index: 2, kind: input, shape index: {}]   ;;  %s1617_s3 = inlined_call_operand.hbm [shape: f32[16,256], index: 3, kind: output, shape index: {}]  }
   0x1   :  { %9 = vsyncpa [#allocation7], 0 }
   0x2   :  { %11 = vsyncpa [#allocation7 + $0x1], 0 }
   0x3   :  { %12 = vsyncpa [#allocation5], 0  ;;  %s1251_s12 = smov 0   ;;  %s1253_s13 = smov 0  }
   0x4   :  { %s1255_s14 = smov 0   ;;  %s1257_s15 = smov 0  }
   0x5   :  { %s1259_s16 = smov 0   ;;  %s1261_s17 = smov 0  }
   0x6 LB: > { %s27_s18 = sadd.s32 1, %s1213_s16  ;;  %s63_s19 = sadd.s32 1, %s1205_s14  ;;  %s1217_s17 = sphi %s1261_s17, %s18_s17   ;;  %s1213_s16 = sphi %s1259_s16, %s1626_s16   ;;  %s1209_s15 = sphi %s1257_s15, %s1625_s15   ;;  %s1205_s14 = sphi %s1255_s14, %s1624_s14   ;;  %s1201_s13 = sphi %s1253_s13, %s1623_s13   ;;  %s1197_s12 = sphi %s1251_s12, %s1622_s12  }
   0x7   : > { %p28_p0 = scmp.ge.s32.totalorder %s27_s18, 3  ;;  %p70_p1 = scmp.ne.s32.totalorder %s1205_s14, %s1201_s13 }
   0x8   : > { %p71_p2 = scmp.eq.s32.totalorder %s1217_s17, 0  ;;  %p975_p4 = scmp.lt.s32.totalorder %s1217_s17, 3 }
   0x9   : > { %s1628_s18 = smov (%p28_p0, %s27_s18), 0  ;;  %s169_s21 = sand.u32 1, %s1217_s17  }
   0xa   : > { %p72_p3 = por %p71_p2, %p70_p1  ;;  %s60_s20 = ssub.s32 %s1213_s16, %s1628_s18 }
   0xb   : > { %p61_p5 = scmp.eq.s32.totalorder %s60_s20, 0  ;;  %s171_s22 = sand.u32 1, %s1205_s14  }
   0xc   : > { %s884_s23 = sshll.u32 %s1213_s16, 9  ;;  %s863_s25 = sshll.u32 %s171_s22, 10 }
   0xd   : > { %s1295_s24 = scalar_select %p61_p5, %s1205_s14, %s63_s19  }
   0xe   : > { %s179_s28 = scalar_lea.hbm %s1615_s1, %s884_s23  ;;  %p1302_p6 = pnand %p975_p4, %p72_p3 }
   0xf   : > { %s173_s30 = scalar_lea.vmem [#allocation6], %s863_s25  ;;  %s1306_s5 = scalar_lea.sflag [#allocation7], %s169_s21 }
  0x10   : > { %s180_s4 = sshll.u32 %s173_s30, 4  ;;  %p1055_p7 = pneg %p1302_p6  ;;  %s181_s4 = int_to_ptr.vmem [resolvable:$true] %s180_s4 }
  0x11   : > { %s1066_s6 = scalar_lea.vmem %s181_s4, 16384  ;;  %s1219_s7 = smov [#allocation6]  }
  0x12   : > { %p1067_p8 = scmp.ne.s32.totalorder %s181_s4, %s1066_s6  ;;  %s1071_s8 = sshll.u32 %s1219_s7, 4  ;;  %s1072_s8 = int_to_ptr.vmem [resolvable:$false] %s1071_s8 }
  0x13   : > { %s1073_s9 = scalar_lea.vmem %s1072_s8, 32768  ;;  %p1074_p11 = scmp.lt.s32.totalorder %s181_s4, %s1072_s8 }
  0x14   : > { %p1069_p9 = pnand %p1067_p8, %p1055_p7  ;;  %p1075_p12 = scmp.lt.s32.totalorder %s1073_s9, %s1066_s6 }
  0x16   : > { %p1070_p10 = pneg %p1069_p9  ;;  %p1076_p13 = por %p1075_p12, %p1074_p11 }
  0x18   : > { %p1077_p0 = pnand %p1076_p13, %p1070_p10 }
  0x1a   : > { %1080 = shalt.err (!%p1077_p0)
}
  0x1b   : > { %s1220_s10 = smov 1536   ;;  %s1221_s11 = smov 512  }
  0x1c   : > { %s1222_s19 = smov 32   ;;  %s1317_s20 = sadd.s32 4294967295, %s1217_s17  }
  0x1d   : > { %970 = dma.hbm_to_vmem [thread:$0]  (!%p1302_p6), %s179_s28, 16384, %s181_s4, %s1306_s5, %s1220_s10, %s1221_s11, %s1222_s19  }
  0x1e   : > { %p76_p1 = scmp.ne.s32.totalorder %s1201_s13, %s1197_s12  ;;  %p77_p2 = scmp.eq.s32.totalorder %s1317_s20, 0 }
  0x1f   : > { %p860_p3 = scmp.ge.s32.totalorder %s1217_s17, 1  ;;  %p139_p4 = scmp.lt.s32.totalorder %s1217_s17, 4 }
  0x20   : > { %p1326_p5 = por %p77_p2, %p76_p1  ;;  %s1223_s25 = smov [#allocation3]  }
  0x21   : > { %p1330_p8 = pnand %p860_p3, %p139_p4  ;;  %s155_s26 = sshll.u32 %s1223_s25, 4  ;;  %s156_s26 = int_to_ptr.vmem [resolvable:$true] %s155_s26 }
  0x22   : > { %s866_s12 = sshll.u32 %s171_s22, 9  ;;  %s886_s27 = sshll.u32 %s1213_s16, 13 }
  0x23   : > { %p963_p9 = pneg %p1330_p8  ;;  %s1348_s6 = scalar_lea.hbm %s1616_s2, %s886_s27 }
  0x24   : > { %s194_s7 = scalar_lea.vmem [#allocation8], %s866_s12  ;;  %s1092_s9 = scalar_lea.vmem %s156_s26, 512 }
  0x25   : > { %p1341_p10 = pnand %p963_p9, %p77_p2  ;;  %s202_s8 = sshll.u32 %s194_s7, 4  ;;  %s1350_s8 = int_to_ptr.vmem [resolvable:$true] %s202_s8 }
  0x26   : > { %p1093_p12 = scmp.ne.s32.totalorder %s156_s26, %s1092_s9  ;;  %p1100_p1 = scmp.lt.s32.totalorder %s156_s26, %s156_s26 }
  0x27   : > { %p1083_p11 = pneg %p1341_p10  ;;  %p1101_p3 = scmp.lt.s32.totalorder %s1092_s9, %s1092_s9 }
  0x29   : > { %p1095_p13 = pnand %p1093_p12, %p1083_p11  ;;  %p1102_p4 = por %p1101_p3, %p1100_p1 }
  0x2b   : > { %p1096_p0 = pneg %p1095_p13 }
  0x2d   : > { %p1103_p9 = pnand %p1102_p4, %p1096_p0 }
  0x2f   : > { %1106 = shalt.err (!%p1103_p9)
}
  0x30   : > { %s1224_s22 = smov 256   ;;  %s1225_s10 = smov 16  }
  0x31   : > { %966 = dma.hbm_to_vmem [thread:$0]  (!%p1341_p10), %s1614_s0, 512, %s156_s26, [#allocation4], %s1224_s22, %s1224_s22, %s1225_s10  }
  0x32   : > { %s1120_s25 = scalar_lea.vmem %s1350_s8, 8192  ;;  %s1226_s12 = smov [#allocation8]  }
  0x33   : > { %p1121_p11 = scmp.ne.s32.totalorder %s1350_s8, %s1120_s25  ;;  %s1125_s27 = sshll.u32 %s1226_s12, 4  ;;  %s1126_s27 = int_to_ptr.vmem [resolvable:$false] %s1125_s27 }
  0x34   : > { %s1127_s30 = scalar_lea.vmem %s1126_s27, 16384  ;;  %p1128_p0 = scmp.lt.s32.totalorder %s1350_s8, %s1126_s27 }
  0x35   : > { %p1123_p12 = pnand %p1121_p11, %p1055_p7  ;;  %p1129_p1 = scmp.lt.s32.totalorder %s1127_s30, %s1120_s25 }
  0x37   : > { %p1124_p13 = pneg %p1123_p12  ;;  %p1130_p3 = por %p1129_p1, %p1128_p0 }
  0x39   : > { %p1131_p4 = pnand %p1130_p3, %p1124_p13 }
  0x3b   : > { %1134 = shalt.err (!%p1131_p4)
}
  0x3c   : > { %973 = dma.hbm_to_vmem [thread:$0]  (!%p1302_p6), %s1348_s6, 8192, %s1350_s8, %s1306_s5, %s1224_s22, %s1224_s22, %s1225_s10  }
  0x3d   : > { %214 = sbr.rel (%p1330_p8) target bundleno = 604 (0x25c), region = 32 }
  0x42   : > { %1184 = dma.done.wait (%p77_p2), [#allocation4], 512  }
  0x43   : > { %1186 = vsyncadd (%p77_p2), [#allocation4], 4294966784  ;;  %s220_s26 = sand.u32 1, %s1317_s20   ;;  %s222_s28 = sand.u32 1, %s1201_s13  }
  0x44   : > { %s872_s4 = sshll.u32 %s222_s28, 10  ;;  %s221_s29 = scalar_lea.sflag [#allocation7], %s220_s26 }
  0x45   : > { %s1378_s7 = scalar_lea.vmem [#allocation6], %s872_s4 }
  0x46   : > { %1188 = dma.done.wait (%p1326_p5), %s221_s29, 24576  }
  0x47   : > { %1190 = vsyncadd (%p1326_p5), %s221_s29, 4294942720  ;;  %s873_s5 = sshll.u32 %s222_s28, 9  ;;  %p874_p6 = scmp.ne.s32.totalorder %s1209_s15, 0 }
  0x48   : > { %s1384_s23 = scalar_lea.vmem [#allocation8], %s873_s5 }
  0x49   : > { %263 = sbr.rel (%p874_p6) target bundleno = 81 (0x51), region = 48 }
  0x4e   : > { %v1227_v0 = vmov 0.0  }
  0x4f   : > { %264 = vst [vmem:[#allocation2 + $0x10] sm:$0xff] %v1227_v0  ;;  %265 = vst [vmem:[#allocation2] sm:$0xff] %v1227_v0 }
  0x50   : > { %266 = vst [vmem:[#allocation2 + $0x18] sm:$0xff] %v1227_v0  ;;  %267 = vst [vmem:[#allocation2 + $0x8] sm:$0xff] %v1227_v0 }
  0x51 PF: > { %v335_v1 = vld [vmem:[%s1378_s7 + $0x1f8] sm:$0xff]  ;;  %v334_v2 = vld [vmem:[%s1378_s7 + $0x1f0] sm:$0xff]  ;;  %v333_v14 = vld [vmem:[%s1378_s7 + $0x1e8] sm:$0xff]  ;;  %p879_p7 = scmp.ne.s32.totalorder %s1209_s15, 2 }
  0x52   : > { %v331_v3 = vld [vmem:[%s1378_s7 + $0x1d8] sm:$0xff]  ;;  %477 = vmatprep.subr.mxu1 %v335_v1  ;;  %v330_v4 = vld [vmem:[%s1378_s7 + $0x1d0] sm:$0xff]  ;;  %400 = vmatprep.subr.mxu0 %v333_v14  ;;  %v332_v16 = vld [vmem:[%s1378_s7 + $0x1e0] sm:$0xff] }
  0x53   : > { %478 = vmatpush1.msra.mxu1 %v334_v2  ;;  %v327_v5 = vld [vmem:[%s1378_s7 + $0x1b8] sm:$0xff]  ;;  %v326_v6 = vld [vmem:[%s1378_s7 + $0x1b0] sm:$0xff]  ;;  %401 = vmatpush1.msra.mxu0 %v332_v16  ;;  %v329_v18 = vld [vmem:[%s1378_s7 + $0x1c8] sm:$0xff] }
  0x54   : > { %479 = vmatprep.subr.mxu1 %v331_v3  ;;  %v323_v7 = vld [vmem:[%s1378_s7 + $0x198] sm:$0xff]  ;;  %v322_v8 = vld [vmem:[%s1378_s7 + $0x190] sm:$0xff]  ;;  %v328_v19 = vld [vmem:[%s1378_s7 + $0x1c0] sm:$0xff]  ;;  %402 = vmatprep.subr.mxu0 %v329_v18 }
  0x55   : > { %480 = vmatpush1.msra.mxu1 %v330_v4  ;;  %v319_v9 = vld [vmem:[%s1378_s7 + $0x178] sm:$0xff]  ;;  %v318_v10 = vld [vmem:[%s1378_s7 + $0x170] sm:$0xff]  ;;  %v325_v21 = vld [vmem:[%s1378_s7 + $0x1a8] sm:$0xff]  ;;  %403 = vmatpush1.msra.mxu0 %v328_v19 }
  0x56   : > { %481 = vmatprep.subr.mxu1 %v327_v5  ;;  %v315_v11 = vld [vmem:[%s1378_s7 + $0x158] sm:$0xff]  ;;  %v314_v12 = vld [vmem:[%s1378_s7 + $0x150] sm:$0xff]  ;;  %v324_v23 = vld [vmem:[%s1378_s7 + $0x1a0] sm:$0xff]  ;;  %404 = vmatprep.subr.mxu0 %v325_v21 }
  0x57   : > { %482 = vmatpush1.msra.mxu1 %v326_v6  ;;  %v311_v13 = vld [vmem:[%s1378_s7 + $0x138] sm:$0xff]  ;;  %v310_v15 = vld [vmem:[%s1378_s7 + $0x130] sm:$0xff]  ;;  %v321_v24 = vld [vmem:[%s1378_s7 + $0x188] sm:$0xff]  ;;  %405 = vmatpush1.msra.mxu0 %v324_v23 }
  0x58   : > { %483 = vmatprep.subr.mxu1 %v323_v7  ;;  %v307_v17 = vld [vmem:[%s1378_s7 + $0x118] sm:$0xff]  ;;  %v306_v20 = vld [vmem:[%s1378_s7 + $0x110] sm:$0xff]  ;;  %v320_v26 = vld [vmem:[%s1378_s7 + $0x180] sm:$0xff]  ;;  %406 = vmatprep.subr.mxu0 %v321_v24 }
  0x59   : > { %484 = vmatpush1.msra.mxu1 %v322_v8  ;;  %v303_v22 = vld [vmem:[%s1378_s7 + $0xf8] sm:$0xff]  ;;  %v302_v25 = vld [vmem:[%s1378_s7 + $0xf0] sm:$0xff]  ;;  %v317_v28 = vld [vmem:[%s1378_s7 + $0x168] sm:$0xff]  ;;  %407 = vmatpush1.msra.mxu0 %v320_v26 }
  0x5a   : > { %485 = vmatprep.subr.mxu1 %v319_v9  ;;  %v299_v27 = vld [vmem:[%s1378_s7 + $0xd8] sm:$0xff]  ;;  %v298_v29 = vld [vmem:[%s1378_s7 + $0xd0] sm:$0xff]  ;;  %v316_v30 = vld [vmem:[%s1378_s7 + $0x160] sm:$0xff]  ;;  %408 = vmatprep.subr.mxu0 %v317_v28 }
  0x5b   : > { %486 = vmatpush1.msra.mxu1 %v318_v10  ;;  %v295_v31 = vld [vmem:[%s1378_s7 + $0xb8] sm:$0xff]  ;;  %v313_v32 = vld [vmem:[%s1378_s7 + $0x148] sm:$0xff]  ;;  %v294_v33 = vld [vmem:[%s1378_s7 + $0xb0] sm:$0xff]  ;;  %409 = vmatpush1.msra.mxu0 %v316_v30 }
  0x5c   : > { %487 = vmatprep.subr.mxu1 %v315_v11  ;;  %v312_v34 = vld [vmem:[%s1378_s7 + $0x140] sm:$0xff]  ;;  %v291_v35 = vld [vmem:[%s1378_s7 + $0x98] sm:$0xff]  ;;  %v309_v36 = vld [vmem:[%s1378_s7 + $0x128] sm:$0xff]  ;;  %410 = vmatprep.subr.mxu0 %v313_v32 }
  0x5d   : > { %488 = vmatpush1.msra.mxu1 %v314_v12  ;;  %v290_v37 = vld [vmem:[%s1378_s7 + $0x90] sm:$0xff]  ;;  %v308_v38 = vld [vmem:[%s1378_s7 + $0x120] sm:$0xff]  ;;  %v287_v39 = vld [vmem:[%s1378_s7 + $0x78] sm:$0xff]  ;;  %411 = vmatpush1.msra.mxu0 %v312_v34 }
  0x5e   : > { %489 = vmatprep.subr.mxu1 %v311_v13  ;;  %v305_v40 = vld [vmem:[%s1378_s7 + $0x108] sm:$0xff]  ;;  %v286_v41 = vld [vmem:[%s1378_s7 + $0x70] sm:$0xff]  ;;  %412 = vmatprep.subr.mxu0 %v309_v36  ;;  %v304_v42 = vld [vmem:[%s1378_s7 + $0x100] sm:$0xff] }
  0x5f   : > { %490 = vmatpush1.msra.mxu1 %v310_v15  ;;  %v283_v43 = vld [vmem:[%s1378_s7 + $0x58] sm:$0xff]  ;;  %413 = vmatpush1.msra.mxu0 %v308_v38  ;;  %v301_v44 = vld [vmem:[%s1378_s7 + $0xe8] sm:$0xff]  ;;  %v282_v45 = vld [vmem:[%s1378_s7 + $0x50] sm:$0xff] }
  0x60   : > { %491 = vmatprep.subr.mxu1 %v307_v17  ;;  %414 = vmatprep.subr.mxu0 %v305_v40  ;;  %v300_v46 = vld [vmem:[%s1378_s7 + $0xe0] sm:$0xff]  ;;  %v279_v47 = vld [vmem:[%s1378_s7 + $0x38] sm:$0xff]  ;;  %v297_v48 = vld [vmem:[%s1378_s7 + $0xc8] sm:$0xff] }
  0x61   : > { %492 = vmatpush1.msra.mxu1 %v306_v20  ;;  %415 = vmatpush1.msra.mxu0 %v304_v42  ;;  %v278_v49 = vld [vmem:[%s1378_s7 + $0x30] sm:$0xff]  ;;  %v296_v50 = vld [vmem:[%s1378_s7 + $0xc0] sm:$0xff]  ;;  %v275_v51 = vld [vmem:[%s1378_s7 + $0x18] sm:$0xff] }
  0x62   : > { %493 = vmatprep.subr.mxu1 %v303_v22  ;;  %416 = vmatprep.subr.mxu0 %v301_v44  ;;  %v293_v52 = vld [vmem:[%s1378_s7 + $0xa8] sm:$0xff]  ;;  %v274_v53 = vld [vmem:[%s1378_s7 + $0x10] sm:$0xff]  ;;  %v292_v54 = vld [vmem:[%s1378_s7 + $0xa0] sm:$0xff] }
  0x63   : > { %494 = vmatpush1.msra.mxu1 %v302_v25  ;;  %417 = vmatpush1.msra.mxu0 %v300_v46  ;;  %v399_v55 = vld [vmem:[%s1378_s7 + $0x3f8] sm:$0xff]  ;;  %v289_v56 = vld [vmem:[%s1378_s7 + $0x88] sm:$0xff]  ;;  %v398_v57 = vld [vmem:[%s1378_s7 + $0x3f0] sm:$0xff] }
  0x64   : > { %495 = vmatprep.subr.mxu1 %v299_v27  ;;  %418 = vmatprep.subr.mxu0 %v297_v48  ;;  %v288_v58 = vld [vmem:[%s1378_s7 + $0x80] sm:$0xff]  ;;  %v395_v59 = vld [vmem:[%s1378_s7 + $0x3d8] sm:$0xff]  ;;  %v285_v60 = vld [vmem:[%s1378_s7 + $0x68] sm:$0xff] }
  0x65   : > { %496 = vmatpush1.msra.mxu1 %v298_v29  ;;  %419 = vmatpush1.msra.mxu0 %v296_v50  ;;  %v394_v61 = vld [vmem:[%s1378_s7 + $0x3d0] sm:$0xff]  ;;  %v284_v62 = vld [vmem:[%s1378_s7 + $0x60] sm:$0xff]  ;;  %v391_v63 = vld [vmem:[%s1378_s7 + $0x3b8] sm:$0xff] }
  0x66   : > { %497 = vmatprep.subr.mxu1 %v295_v31  ;;  %420 = vmatprep.subr.mxu0 %v293_v52  ;;  %v281_v0 = vld [vmem:[%s1378_s7 + $0x48] sm:$0xff]  ;;  %v390_v1 = vld [vmem:[%s1378_s7 + $0x3b0] sm:$0xff]  ;;  %v280_v2 = vld [vmem:[%s1378_s7 + $0x40] sm:$0xff] }
  0x67   : > { %498 = vmatpush1.msra.mxu1 %v294_v33  ;;  %421 = vmatpush1.msra.mxu0 %v292_v54  ;;  %v387_v3 = vld [vmem:[%s1378_s7 + $0x398] sm:$0xff]  ;;  %v277_v4 = vld [vmem:[%s1378_s7 + $0x28] sm:$0xff]  ;;  %v386_v5 = vld [vmem:[%s1378_s7 + $0x390] sm:$0xff] }
  0x68   : > { %499 = vmatprep.subr.mxu1 %v291_v35  ;;  %422 = vmatprep.subr.mxu0 %v289_v56  ;;  %v276_v6 = vld [vmem:[%s1378_s7 + $0x20] sm:$0xff]  ;;  %v383_v7 = vld [vmem:[%s1378_s7 + $0x378] sm:$0xff]  ;;  %v273_v8 = vld [vmem:[%s1378_s7 + $0x8] sm:$0xff] }
  0x69   : > { %500 = vmatpush1.msra.mxu1 %v290_v37  ;;  %423 = vmatpush1.msra.mxu0 %v288_v58  ;;  %v382_v9 = vld [vmem:[%s1378_s7 + $0x370] sm:$0xff]  ;;  %v272_v10 = vld [vmem:[%s1378_s7] sm:$0xff]  ;;  %v379_v11 = vld [vmem:[%s1378_s7 + $0x358] sm:$0xff] }
  0x6a   : > { %501 = vmatprep.subr.mxu1 %v287_v39  ;;  %424 = vmatprep.subr.mxu0 %v285_v60  ;;  %v1462_v12 = vld [vmem:[#allocation3 + $0x8] sm:$0xff]  ;;  %v378_v13 = vld [vmem:[%s1378_s7 + $0x350] sm:$0xff]  ;;  %v375_v15 = vld [vmem:[%s1378_s7 + $0x338] sm:$0xff] }
  0x6b   : > { %502 = vmatpush1.msra.mxu1 %v286_v41  ;;  %425 = vmatpush1.msra.mxu0 %v284_v62  ;;  %v397_v14 = vld [vmem:[%s1378_s7 + $0x3e8] sm:$0xff]  ;;  %v396_v16 = vld [vmem:[%s1378_s7 + $0x3e0] sm:$0xff]  ;;  %v374_v17 = vld [vmem:[%s1378_s7 + $0x330] sm:$0xff] }
  0x6c   : > { %503 = vmatprep.subr.mxu1 %v283_v43  ;;  %426 = vmatprep.subr.mxu0 %v281_v0  ;;  %v393_v18 = vld [vmem:[%s1378_s7 + $0x3c8] sm:$0xff]  ;;  %v371_v19 = vld [vmem:[%s1378_s7 + $0x318] sm:$0xff]  ;;  %v392_v20 = vld [vmem:[%s1378_s7 + $0x3c0] sm:$0xff] }
  0x6d   : > { %504 = vmatpush1.msra.mxu1 %v282_v45  ;;  %427 = vmatpush1.msra.mxu0 %v280_v2  ;;  %v370_v21 = vld [vmem:[%s1378_s7 + $0x310] sm:$0xff]  ;;  %v389_v22 = vld [vmem:[%s1378_s7 + $0x3a8] sm:$0xff]  ;;  %v367_v23 = vld [vmem:[%s1378_s7 + $0x2f8] sm:$0xff] }
  0x6e   : > { %505 = vmatprep.subr.mxu1 %v279_v47  ;;  %428 = vmatprep.subr.mxu0 %v277_v4  ;;  %v388_v24 = vld [vmem:[%s1378_s7 + $0x3a0] sm:$0xff]  ;;  %v366_v25 = vld [vmem:[%s1378_s7 + $0x2f0] sm:$0xff]  ;;  %v385_v26 = vld [vmem:[%s1378_s7 + $0x388] sm:$0xff] }
  0x6f   : > { %506 = vmatpush1.msra.mxu1 %v278_v49  ;;  %429 = vmatpush1.msra.mxu0 %v276_v6  ;;  %v363_v27 = vld [vmem:[%s1378_s7 + $0x2d8] sm:$0xff]  ;;  %v384_v28 = vld [vmem:[%s1378_s7 + $0x380] sm:$0xff]  ;;  %v362_v29 = vld [vmem:[%s1378_s7 + $0x2d0] sm:$0xff] }
  0x70   : > { %507 = vmatprep.subr.mxu1 %v275_v51  ;;  %430 = vmatprep.subr.mxu0 %v273_v8  ;;  %v381_v30 = vld [vmem:[%s1378_s7 + $0x368] sm:$0xff]  ;;  %v359_v31 = vld [vmem:[%s1378_s7 + $0x2b8] sm:$0xff]  ;;  %v380_v32 = vld [vmem:[%s1378_s7 + $0x360] sm:$0xff] }
  0x71   : > { %508 = vmatpush1.msra.mxu1 %v274_v53  ;;  %431 = vmatpush1.msra.mxu0 %v272_v10  ;;  %v358_v33 = vld [vmem:[%s1378_s7 + $0x2b0] sm:$0xff]  ;;  %v377_v34 = vld [vmem:[%s1378_s7 + $0x348] sm:$0xff]  ;;  %v355_v35 = vld [vmem:[%s1378_s7 + $0x298] sm:$0xff] }
  0x72   : > { %509 = vmatprep.subr.mxu1 %v399_v55  ;;  %541 = vmatprep.mubr.f32.mxu1 %v1462_v12  ;;  %v376_v36 = vld [vmem:[%s1378_s7 + $0x340] sm:$0xff]  ;;  %v354_v37 = vld [vmem:[%s1378_s7 + $0x290] sm:$0xff]  ;;  %v373_v38 = vld [vmem:[%s1378_s7 + $0x328] sm:$0xff] }
  0x73   : > { %510 = vmatpush2.msra.mxu1 %v398_v57  ;;  %432 = vmatprep.subr.mxu0 %v397_v14  ;;  %v351_v39 = vld [vmem:[%s1378_s7 + $0x278] sm:$0xff]  ;;  %v372_v40 = vld [vmem:[%s1378_s7 + $0x320] sm:$0xff]  ;;  %v350_v41 = vld [vmem:[%s1378_s7 + $0x270] sm:$0xff] }
  0x74   : > { %511 = vmatprep.subr.mxu1 %v395_v59  ;;  %433 = vmatpush2.msra.mxu0 %v396_v16  ;;  %v369_v42 = vld [vmem:[%s1378_s7 + $0x308] sm:$0xff]  ;;  %v347_v43 = vld [vmem:[%s1378_s7 + $0x258] sm:$0xff]  ;;  %v368_v44 = vld [vmem:[%s1378_s7 + $0x300] sm:$0xff] }
  0x75   : > { %512 = vmatpush2.msra.mxu1 %v394_v61  ;;  %434 = vmatprep.subr.mxu0 %v393_v18  ;;  %v346_v45 = vld [vmem:[%s1378_s7 + $0x250] sm:$0xff]  ;;  %v365_v46 = vld [vmem:[%s1378_s7 + $0x2e8] sm:$0xff]  ;;  %v343_v47 = vld [vmem:[%s1378_s7 + $0x238] sm:$0xff] }
  0x76   : > { %513 = vmatprep.subr.mxu1 %v391_v63  ;;  %435 = vmatpush2.msra.mxu0 %v392_v20  ;;  %v364_v48 = vld [vmem:[%s1378_s7 + $0x2e0] sm:$0xff]  ;;  %v342_v49 = vld [vmem:[%s1378_s7 + $0x230] sm:$0xff]  ;;  %v361_v50 = vld [vmem:[%s1378_s7 + $0x2c8] sm:$0xff] }
  0x77   : > { %514 = vmatpush2.msra.mxu1 %v390_v1  ;;  %436 = vmatprep.subr.mxu0 %v389_v22  ;;  %v339_v51 = vld [vmem:[%s1378_s7 + $0x218] sm:$0xff]  ;;  %v360_v52 = vld [vmem:[%s1378_s7 + $0x2c0] sm:$0xff]  ;;  %v338_v53 = vld [vmem:[%s1378_s7 + $0x210] sm:$0xff] }
  0x78   : > { %515 = vmatprep.subr.mxu1 %v387_v3  ;;  %437 = vmatpush2.msra.mxu0 %v388_v24  ;;  %v357_v54 = vld [vmem:[%s1378_s7 + $0x2a8] sm:$0xff]  ;;  %v268_v55 = vld [vmem:[#allocation3] sm:$0xff]  ;;  %v271_v57 = vld [vmem:[#allocation3 + $0x18] sm:$0xff] }
  0x79   : > { %516 = vmatpush2.msra.mxu1 %v386_v5  ;;  %438 = vmatprep.subr.mxu0 %v385_v26  ;;  %v356_v56 = vld [vmem:[%s1378_s7 + $0x2a0] sm:$0xff]  ;;  %v353_v58 = vld [vmem:[%s1378_s7 + $0x288] sm:$0xff]  ;;  %v270_v61 = vld [vmem:[#allocation3 + $0x10] sm:$0xff] }
  0x7a   : > { %517 = vmatprep.subr.mxu1 %v383_v7  ;;  %439 = vmatpush2.msra.mxu0 %v384_v28  ;;  %v352_v59 = vld [vmem:[%s1378_s7 + $0x280] sm:$0xff]  ;;  %v349_v60 = vld [vmem:[%s1378_s7 + $0x268] sm:$0xff]  ;;  %v621_v0 = vld [vmem:[%s1384_s23 + $0xf8] sm:$0xff] }
  0x7b   : > { %518 = vmatpush2.msra.mxu1 %v382_v9  ;;  %440 = vmatprep.subr.mxu0 %v381_v30  ;;  %v348_v62 = vld [vmem:[%s1378_s7 + $0x260] sm:$0xff]  ;;  %v345_v63 = vld [vmem:[%s1378_s7 + $0x248] sm:$0xff]  ;;  %v620_v3 = vld [vmem:[%s1384_s23 + $0xf0] sm:$0xff] }
  0x7c   : > { %519 = vmatprep.subr.mxu1 %v379_v11  ;;  %441 = vmatpush2.msra.mxu0 %v380_v32  ;;  %v344_v1 = vld [vmem:[%s1378_s7 + $0x240] sm:$0xff]  ;;  %v341_v2 = vld [vmem:[%s1378_s7 + $0x228] sm:$0xff]  ;;  %v617_v9 = vld [vmem:[%s1384_s23 + $0xd8] sm:$0xff] }
  0x7d   : > { %520 = vmatpush2.msra.mxu1 %v378_v13  ;;  %442 = vmatprep.subr.mxu0 %v377_v34  ;;  %v340_v4 = vld [vmem:[%s1378_s7 + $0x220] sm:$0xff]  ;;  %v619_v5 = vld [vmem:[%s1384_s23 + $0xe8] sm:$0xff]  ;;  %v616_v10 = vld [vmem:[%s1384_s23 + $0xd0] sm:$0xff] }
  0x7e   : > { %521 = vmatprep.subr.mxu1 %v375_v15  ;;  %443 = vmatpush2.msra.mxu0 %v376_v36  ;;  %v337_v6 = vld [vmem:[%s1378_s7 + $0x208] sm:$0xff]  ;;  %v618_v7 = vld [vmem:[%s1384_s23 + $0xe0] sm:$0xff]  ;;  %v613_v13 = vld [vmem:[%s1384_s23 + $0xb8] sm:$0xff] }
  0x7f   : > { %522 = vmatpush2.msra.mxu1 %v374_v17  ;;  %444 = vmatprep.subr.mxu0 %v373_v38  ;;  %v336_v8 = vld [vmem:[%s1378_s7 + $0x200] sm:$0xff]  ;;  %v615_v11 = vld [vmem:[%s1384_s23 + $0xc8] sm:$0xff]  ;;  %v612_v14 = vld [vmem:[%s1384_s23 + $0xb0] sm:$0xff] }
  0x80   : > { %523 = vmatprep.subr.mxu1 %v371_v19  ;;  %445 = vmatpush2.msra.mxu0 %v372_v40  ;;  %v611_v15 = vld [vmem:[%s1384_s23 + $0xa8] sm:$0xff]  ;;  %v610_v16 = vld [vmem:[%s1384_s23 + $0xa0] sm:$0xff]  ;;  %v609_v17 = vld [vmem:[%s1384_s23 + $0x98] sm:$0xff] }
  0x81   : > { %524 = vmatpush2.msra.mxu1 %v370_v21  ;;  %446 = vmatprep.subr.mxu0 %v369_v42  ;;  %v608_v18 = vld [vmem:[%s1384_s23 + $0x90] sm:$0xff]  ;;  %v607_v19 = vld [vmem:[%s1384_s23 + $0x88] sm:$0xff]  ;;  %v606_v20 = vld [vmem:[%s1384_s23 + $0x80] sm:$0xff] }
  0x82   : > { %525 = vmatprep.subr.mxu1 %v367_v23  ;;  %447 = vmatpush2.msra.mxu0 %v368_v44  ;;  %v605_v21 = vld [vmem:[%s1384_s23 + $0x78] sm:$0xff]  ;;  %v604_v22 = vld [vmem:[%s1384_s23 + $0x70] sm:$0xff]  ;;  %v603_v23 = vld [vmem:[%s1384_s23 + $0x68] sm:$0xff] }
  0x83   : > { %526 = vmatpush2.msra.mxu1 %v366_v25  ;;  %448 = vmatprep.subr.mxu0 %v365_v46  ;;  %v602_v24 = vld [vmem:[%s1384_s23 + $0x60] sm:$0xff]  ;;  %v601_v25 = vld [vmem:[%s1384_s23 + $0x58] sm:$0xff]  ;;  %v600_v26 = vld [vmem:[%s1384_s23 + $0x50] sm:$0xff] }
  0x84   : > { %527 = vmatprep.subr.mxu1 %v363_v27  ;;  %449 = vmatpush2.msra.mxu0 %v364_v48  ;;  %v599_v27 = vld [vmem:[%s1384_s23 + $0x48] sm:$0xff]  ;;  %v598_v28 = vld [vmem:[%s1384_s23 + $0x40] sm:$0xff]  ;;  %v596_v30 = vld [vmem:[%s1384_s23 + $0x30] sm:$0xff] }
  0x85   : > { %528 = vmatpush2.msra.mxu1 %v362_v29  ;;  %450 = vmatprep.subr.mxu0 %v361_v50  ;;  %v597_v29 = vld [vmem:[%s1384_s23 + $0x38] sm:$0xff]  ;;  %v594_v32 = vld [vmem:[%s1384_s23 + $0x20] sm:$0xff]  ;;  %v592_v34 = vld [vmem:[%s1384_s23 + $0x10] sm:$0xff] }
  0x86   : > { %529 = vmatprep.subr.mxu1 %v359_v31  ;;  %451 = vmatpush2.msra.mxu0 %v360_v52  ;;  %v595_v31 = vld [vmem:[%s1384_s23 + $0x28] sm:$0xff]  ;;  %v590_v36 = vld [vmem:[%s1384_s23] sm:$0xff]  ;;  %v652_v38 = vld [vmem:[%s1384_s23 + $0x1f0] sm:$0xff] }
  0x87   : > { %530 = vmatpush2.msra.mxu1 %v358_v33  ;;  %452 = vmatprep.subr.mxu0 %v357_v54  ;;  %v593_v33 = vld [vmem:[%s1384_s23 + $0x18] sm:$0xff]  ;;  %v650_v40 = vld [vmem:[%s1384_s23 + $0x1e0] sm:$0xff]  ;;  %v648_v42 = vld [vmem:[%s1384_s23 + $0x1d0] sm:$0xff] }
  0x88   : > { %531 = vmatprep.subr.mxu1 %v355_v35  ;;  %453 = vmatpush2.msra.mxu0 %v356_v56  ;;  %v591_v35 = vld [vmem:[%s1384_s23 + $0x8] sm:$0xff]  ;;  %v646_v44 = vld [vmem:[%s1384_s23 + $0x1c0] sm:$0xff]  ;;  %v644_v46 = vld [vmem:[%s1384_s23 + $0x1b0] sm:$0xff] }
  0x89   : > { %532 = vmatpush2.msra.mxu1 %v354_v37  ;;  %454 = vmatprep.subr.mxu0 %v353_v58  ;;  %v653_v37 = vld [vmem:[%s1384_s23 + $0x1f8] sm:$0xff]  ;;  %v642_v48 = vld [vmem:[%s1384_s23 + $0x1a0] sm:$0xff]  ;;  %v640_v50 = vld [vmem:[%s1384_s23 + $0x190] sm:$0xff] }
  0x8a   : > { %533 = vmatprep.subr.mxu1 %v351_v39  ;;  %455 = vmatpush2.msra.mxu0 %v352_v59  ;;  %v651_v39 = vld [vmem:[%s1384_s23 + $0x1e8] sm:$0xff]  ;;  %v638_v52 = vld [vmem:[%s1384_s23 + $0x180] sm:$0xff]  ;;  %v636_v54 = vld [vmem:[%s1384_s23 + $0x170] sm:$0xff] }
  0x8b   : > { %534 = vmatpush2.msra.mxu1 %v350_v41  ;;  %464 = vmatprep.mubr.f32.mxu0 %v1462_v12  ;;  %v614_v12 = vld [vmem:[%s1384_s23 + $0xc0] sm:$0xff]  ;;  %v649_v41 = vld [vmem:[%s1384_s23 + $0x1d8] sm:$0xff]  ;;  %v632_v58 = vld [vmem:[%s1384_s23 + $0x150] sm:$0xff] }
  0x8c   : > { %535 = vmatprep.subr.mxu1 %v347_v43  ;;  %456 = vmatprep.subr.mxu0 %v349_v60  ;;  %v647_v43 = vld [vmem:[%s1384_s23 + $0x1c8] sm:$0xff]  ;;  %v634_v56 = vld [vmem:[%s1384_s23 + $0x160] sm:$0xff] }
  0x8d   : > { %536 = vmatpush2.msra.mxu1 %v346_v45  ;;  %457 = vmatpush2.msra.mxu0 %v348_v62  ;;  %v645_v45 = vld [vmem:[%s1384_s23 + $0x1b8] sm:$0xff]  ;;  %v631_v59 = vld [vmem:[%s1384_s23 + $0x148] sm:$0xff]  ;;  %v630_v60 = vld [vmem:[%s1384_s23 + $0x140] sm:$0xff] }
  0x8e   : > { %537 = vmatprep.subr.mxu1 %v343_v47  ;;  %458 = vmatprep.subr.mxu0 %v345_v63  ;;  %v643_v47 = vld [vmem:[%s1384_s23 + $0x1a8] sm:$0xff]  ;;  %v628_v62 = vld [vmem:[%s1384_s23 + $0x130] sm:$0xff] }
  0x8f   : > { %538 = vmatpush2.msra.mxu1 %v342_v49  ;;  %459 = vmatpush2.msra.mxu0 %v344_v1  ;;  %v641_v49 = vld [vmem:[%s1384_s23 + $0x198] sm:$0xff]  ;;  %v627_v63 = vld [vmem:[%s1384_s23 + $0x128] sm:$0xff] }
  0x90   : > { %539 = vmatprep.subr.mxu1 %v339_v51  ;;  %460 = vmatprep.subr.mxu0 %v341_v2  ;;  %v639_v51 = vld [vmem:[%s1384_s23 + $0x188] sm:$0xff]  ;;  %v625_v1 = vld [vmem:[%s1384_s23 + $0x118] sm:$0xff]  ;;  %v624_v2 = vld [vmem:[%s1384_s23 + $0x110] sm:$0xff] }
  0x91   : > { %540 = vmatpush2.msra.mxu1 %v338_v53  ;;  %461 = vmatpush2.msra.mxu0 %v340_v4  ;;  %v637_v53 = vld [vmem:[%s1384_s23 + $0x178] sm:$0xff]  ;;  %v622_v4 = vld [vmem:[%s1384_s23 + $0x100] sm:$0xff] }
  0x92   : > { %542 = vmatmul.mubr.f32.vlgmr.msra.gmra.mxu1 %v268_v55  ;;  %887 = vmatprep.subr.mxu1 %v621_v0 }
  0x93   : > { %547 = vmatprep.mubr.f32.mxu1 %v271_v57  ;;  %919 = vmatpush1.msra.mxu1 %v620_v3 }
  0x94   : > { %888 = vmatprep.subr.mxu1 %v619_v5  ;;  %462 = vmatprep.subr.mxu0 %v337_v6 }
  0x95   : > { %920 = vmatpush1.msra.mxu1 %v618_v7  ;;  %463 = vmatpush2.msra.mxu0 %v336_v8 }
  0x96   : > { %548 = vmatmul.mubr.f32.gmra.mxu1 %v270_v61  ;;  %889 = vmatprep.subr.mxu1 %v617_v9 }
  0x97   : > { %921 = vmatpush1.msra.mxu1 %v616_v10  ;;  %465 = vmatmul.mubr.f32.vlgmr.msra.gmra.mxu0 %v268_v55  ;;  %v635_v55 = vld [vmem:[%s1384_s23 + $0x168] sm:$0xff] }
  0x98   : > { %890 = vmatprep.subr.mxu1 %v615_v11  ;;  %654 = vmatprep.subr.mxu0 %v621_v0  ;;  %v626_v0 = vld [vmem:[%s1384_s23 + $0x120] sm:$0xff] }
  0x99   : > { %470 = vmatprep.mubr.f32.mxu0 %v271_v57  ;;  %655 = vmatpush1.msra.mxu0 %v620_v3  ;;  %v633_v57 = vld [vmem:[%s1384_s23 + $0x158] sm:$0xff]  ;;  %v623_v3 = vld [vmem:[%s1384_s23 + $0x108] sm:$0xff] }
  0x9a   : > { %656 = vmatprep.subr.mxu0 %v619_v5  ;;  %922 = vmatpush1.msra.mxu1 %v614_v12 }
  0x9b   : > { %657 = vmatpush1.msra.mxu0 %v618_v7  ;;  %891 = vmatprep.subr.mxu1 %v613_v13 }
  0x9c   : > { %471 = vmatmul.mubr.f32.gmra.mxu0 %v270_v61  ;;  %658 = vmatprep.subr.mxu0 %v617_v9  ;;  %v629_v61 = vld [vmem:[%s1384_s23 + $0x138] sm:$0xff] }
  0x9d   : > { %659 = vmatpush1.msra.mxu0 %v616_v10  ;;  %923 = vmatpush1.msra.mxu1 %v612_v14 }
  0x9e   : > { %660 = vmatprep.subr.mxu0 %v615_v11  ;;  %892 = vmatprep.subr.mxu1 %v611_v15 }
  0x9f   : > { %661 = vmatpush1.msra.mxu0 %v614_v12  ;;  %924 = vmatpush1.msra.mxu1 %v610_v16 }
  0xa0   : > { %662 = vmatprep.subr.mxu0 %v613_v13  ;;  %893 = vmatprep.subr.mxu1 %v609_v17 }
  0xa1   : > { %663 = vmatpush1.msra.mxu0 %v612_v14  ;;  %925 = vmatpush1.msra.mxu1 %v608_v18 }
  0xa2   : > { %664 = vmatprep.subr.mxu0 %v611_v15  ;;  %894 = vmatprep.subr.mxu1 %v607_v19 }
  0xa3   : > { %665 = vmatpush1.msra.mxu0 %v610_v16  ;;  %926 = vmatpush1.msra.mxu1 %v606_v20 }
  0xa4   : > { %666 = vmatprep.subr.mxu0 %v609_v17  ;;  %895 = vmatprep.subr.mxu1 %v605_v21 }
  0xa5   : > { %667 = vmatpush1.msra.mxu0 %v608_v18  ;;  %927 = vmatpush1.msra.mxu1 %v604_v22 }
  0xa6   : > { %668 = vmatprep.subr.mxu0 %v607_v19  ;;  %896 = vmatprep.subr.mxu1 %v603_v23 }
  0xa7   : > { %669 = vmatpush1.msra.mxu0 %v606_v20  ;;  %928 = vmatpush1.msra.mxu1 %v602_v24 }
  0xa8   : > { %670 = vmatprep.subr.mxu0 %v605_v21  ;;  %897 = vmatprep.subr.mxu1 %v601_v25 }
  0xa9   : > { %671 = vmatpush1.msra.mxu0 %v604_v22  ;;  %929 = vmatpush1.msra.mxu1 %v600_v26 }
  0xaa   : > { %672 = vmatprep.subr.mxu0 %v603_v23  ;;  %898 = vmatprep.subr.mxu1 %v599_v27 }
  0xab   : > { %673 = vmatpush1.msra.mxu0 %v602_v24  ;;  %930 = vmatpush1.msra.mxu1 %v598_v28 }
  0xac   : > { %674 = vmatprep.subr.mxu0 %v601_v25  ;;  %899 = vmatprep.subr.mxu1 %v597_v29 }
  0xad   : > { %675 = vmatpush1.msra.mxu0 %v600_v26  ;;  %931 = vmatpush1.msra.mxu1 %v596_v30 }
  0xae   : > { %676 = vmatprep.subr.mxu0 %v599_v27  ;;  %900 = vmatprep.subr.mxu1 %v595_v31 }
  0xaf   : > { %677 = vmatpush1.msra.mxu0 %v598_v28  ;;  %932 = vmatpush1.msra.mxu1 %v594_v32 }
  0xb0   : > { %678 = vmatprep.subr.mxu0 %v597_v29  ;;  %901 = vmatprep.subr.mxu1 %v593_v33 }
  0xb1   : > { %679 = vmatpush1.msra.mxu0 %v596_v30  ;;  %933 = vmatpush1.msra.mxu1 %v592_v34 }
  0xb2   : > { %680 = vmatprep.subr.mxu0 %v595_v31  ;;  %902 = vmatprep.subr.mxu1 %v591_v35 }
  0xb3   : > { %681 = vmatpush1.msra.mxu0 %v594_v32  ;;  %934 = vmatpush1.msra.mxu1 %v590_v36 }
  0xb4   : > { %682 = vmatprep.subr.mxu0 %v593_v33  ;;  %903 = vmatprep.subr.mxu1 %v653_v37 }
  0xb5   : > { %683 = vmatpush1.msra.mxu0 %v592_v34  ;;  %935 = vmatpush2.msra.mxu1 %v652_v38 }
  0xb6   : > { %684 = vmatprep.subr.mxu0 %v591_v35  ;;  %904 = vmatprep.subr.mxu1 %v651_v39 }
  0xb7   : > { %685 = vmatpush1.msra.mxu0 %v590_v36  ;;  %936 = vmatpush2.msra.mxu1 %v650_v40 }
  0xb8   : > { %686 = vmatprep.subr.mxu0 %v653_v37  ;;  %905 = vmatprep.subr.mxu1 %v649_v41  ;;  %v586_v37 = vld [vmem:[#allocation2 + $0x10] sm:$0xff] }
  0xb9   : > { %687 = vmatpush2.msra.mxu0 %v652_v38  ;;  %937 = vmatpush2.msra.mxu1 %v648_v42 }
  0xba   : > { %688 = vmatprep.subr.mxu0 %v651_v39  ;;  %906 = vmatprep.subr.mxu1 %v647_v43  ;;  %v587_v39 = vld [vmem:[#allocation2] sm:$0xff] }
  0xbb   : > { %689 = vmatpush2.msra.mxu0 %v650_v40  ;;  %938 = vmatpush2.msra.mxu1 %v646_v44 }
  0xbc   : > { %690 = vmatprep.subr.mxu0 %v649_v41  ;;  %907 = vmatprep.subr.mxu1 %v645_v45 }
  0xbd   : > { %691 = vmatpush2.msra.mxu0 %v648_v42  ;;  %939 = vmatpush2.msra.mxu1 %v644_v46  ;;  %v588_v42 = vld [vmem:[#allocation2 + $0x18] sm:$0xff] }
  0xbe   : > { %692 = vmatprep.subr.mxu0 %v647_v43  ;;  %908 = vmatprep.subr.mxu1 %v643_v47 }
  0xbf   : > { %693 = vmatpush2.msra.mxu0 %v646_v44  ;;  %940 = vmatpush2.msra.mxu1 %v642_v48 }
  0xc0   : > { %694 = vmatprep.subr.mxu0 %v645_v45  ;;  %909 = vmatprep.subr.mxu1 %v641_v49  ;;  %v589_v45 = vld [vmem:[#allocation2 + $0x8] sm:$0xff] }
  0xc1   : > { %695 = vmatpush2.msra.mxu0 %v644_v46  ;;  %941 = vmatpush2.msra.mxu1 %v640_v50 }
  0xc2   : > { %696 = vmatprep.subr.mxu0 %v643_v47  ;;  %910 = vmatprep.subr.mxu1 %v639_v51 }
  0xc3   : > { %697 = vmatpush2.msra.mxu0 %v642_v48  ;;  %942 = vmatpush2.msra.mxu1 %v638_v52 }
  0xc4   : > { %698 = vmatprep.subr.mxu0 %v641_v49  ;;  %911 = vmatprep.subr.mxu1 %v637_v53 }
  0xc5   : > { %699 = vmatpush2.msra.mxu0 %v640_v50  ;;  %943 = vmatpush2.msra.mxu1 %v636_v54 }
  0xc6   : > { %700 = vmatprep.subr.mxu0 %v639_v51  ;;  %912 = vmatprep.subr.mxu1 %v635_v55 }
  0xc7   : > { %701 = vmatpush2.msra.mxu0 %v638_v52  ;;  %944 = vmatpush2.msra.mxu1 %v634_v56 }
  0xc8   : > { %702 = vmatprep.subr.mxu0 %v637_v53  ;;  %913 = vmatprep.subr.mxu1 %v633_v57 }
  0xc9   : > { %703 = vmatpush2.msra.mxu0 %v636_v54  ;;  %945 = vmatpush2.msra.mxu1 %v632_v58 }
  0xca   : > { %704 = vmatprep.subr.mxu0 %v635_v55  ;;  %914 = vmatprep.subr.mxu1 %v631_v59 }
  0xcb   : > { %705 = vmatpush2.msra.mxu0 %v634_v56  ;;  %946 = vmatpush2.msra.mxu1 %v630_v60 }
  0xcc   : > { %706 = vmatprep.subr.mxu0 %v633_v57  ;;  %915 = vmatprep.subr.mxu1 %v629_v61 }
  0xcd   : > { %707 = vmatpush2.msra.mxu0 %v632_v58  ;;  %947 = vmatpush2.msra.mxu1 %v628_v62 }
  0xce   : > { %708 = vmatprep.subr.mxu0 %v631_v59  ;;  %916 = vmatprep.subr.mxu1 %v627_v63 }
  0xcf   : > { %709 = vmatpush2.msra.mxu0 %v630_v60  ;;  %948 = vmatpush2.msra.mxu1 %v626_v0 }
  0xd0   : > { %710 = vmatprep.subr.mxu0 %v629_v61  ;;  %917 = vmatprep.subr.mxu1 %v625_v1 }
  0xd1   : > { %711 = vmatpush2.msra.mxu0 %v628_v62  ;;  %949 = vmatpush2.msra.mxu1 %v624_v2 }
  0xd2   : > { %712 = vmatprep.subr.mxu0 %v627_v63  ;;  %918 = vmatprep.subr.mxu1 %v623_v3 }
  0xd3   : > { %713 = vmatpush2.msra.mxu0 %v626_v0  ;;  %950 = vmatpush2.msra.mxu1 %v622_v4 }
  0xd4   : > { %714 = vmatprep.subr.mxu0 %v625_v1 }
  0xd5   : > { %715 = vmatpush2.msra.mxu0 %v624_v2 }
  0xd6   : > { %716 = vmatprep.subr.mxu0 %v623_v3 }
  0xd7   : > { %717 = vmatpush2.msra.mxu0 %v622_v4 }
 0x152   : > { %v543_v5 = vpop.f32.mrf.mxu1 }
 0x153   : > { %v875_v6 = vmul.f32 -1.442695, %v543_v5 }
 0x154   : > { %v545_v7 = vpop.f32.mrf.mxu1 }
 0x155   : > { %1037 = vpow2.f32 %v875_v6  ;;  %v876_v8 = vmul.f32 -1.442695, %v545_v7 }
 0x156   : > { %v549_v9 = vpop.f32.mrf.mxu1 }
 0x157   : > { %1039 = vpow2.f32 %v876_v8  ;;  %v877_v10 = vmul.f32 -1.442695, %v549_v9  ;;  %v466_v21 = vpop.f32.mrf.mxu0 }
 0x158   : > { %v551_v11 = vpop.f32.mrf.mxu1 }
 0x159   : > { %1041 = vpow2.f32 %v877_v10  ;;  %v878_v12 = vmul.f32 -1.442695, %v551_v11  ;;  %v468_v23 = vpop.f32.mrf.mxu0 }
 0x15b   : > { %1043 = vpow2.f32 %v878_v12 }
 0x15c   : > { %v472_v28 = vpop.f32.mrf.mxu0 }
 0x15e   : > { %v474_v34 = vpop.f32.mrf.mxu0 }
 0x162   : > { %v1038_v13 = vpop.eup %1037 }
 0x163   : > { %v566_v14 = vadd.f32 1.0, %v1038_v13 }
 0x164   : > { %v1040_v15 = vpop.eup %1039 }
 0x165   : > { %1045 = vrcp.f32 %v566_v14  ;;  %v567_v16 = vadd.f32 1.0, %v1040_v15 }
 0x166   : > { %v1042_v17 = vpop.eup %1041 }
 0x167   : > { %1047 = vrcp.f32 %v567_v16  ;;  %v568_v18 = vadd.f32 1.0, %v1042_v17 }
 0x168   : > { %v1044_v19 = vpop.eup %1043 }
 0x169   : > { %1049 = vrcp.f32 %v568_v18  ;;  %v569_v20 = vadd.f32 1.0, %v1044_v19 }
 0x16b   : > { %1051 = vrcp.f32 %v569_v20 }
 0x172   : > { %v1046_v22 = vpop.eup %1045 }
 0x173   : > { %v578_v25 = vmul.f32 %v1046_v22, %v543_v5 }
 0x174   : > { %v1048_v24 = vpop.eup %1047 }
 0x175   : > { %v579_v26 = vmul.f32 %v1048_v24, %v545_v7  ;;  %v582_v32 = vmul.f32 %v578_v25, %v466_v21 }
 0x176   : > { %v1050_v27 = vpop.eup %1049 }
 0x177   : > { %v583_v29 = vmul.f32 %v579_v26, %v468_v23  ;;  %v580_v31 = vmul.f32 %v1050_v27, %v549_v9 }
 0x178   : > { %v1052_v30 = vpop.eup %1051 }
 0x179   : > { %v581_v33 = vmul.f32 %v1052_v30, %v551_v11  ;;  %718 = vmatprep.mubr.f32.mxu0 %v583_v29  ;;  %v584_v36 = vmul.f32 %v580_v31, %v472_v28 }
 0x17a   : > { %719 = vmatmul.mubr.f32.vlgmr.msra.gmra.mxu0 %v582_v32 }
 0x17b   : > { %v585_v35 = vmul.f32 %v581_v33, %v474_v34 }
 0x17d   : > { %724 = vmatprep.mubr.f32.mxu1 %v585_v35 }
 0x17e   : > { %725 = vmatmul.mubr.f32.vlgmr.msra.gmra.mxu1 %v584_v36 }
 0x23a   : > { %v720_v38 = vpop.f32.mrf.mxu0 }
 0x23b   : > { %v731_v40 = vadd.f32 %v720_v38, %v586_v37 }
 0x23c   : > { %v722_v41 = vpop.f32.mrf.mxu0 }
 0x23d   : > { %735 = vst [vmem:[#allocation2 + $0x10] sm:$0xff] %v731_v40  ;;  %v732_v43 = vadd.f32 %v722_v41, %v587_v39 }
 0x23e   : > { %v726_v44 = vpop.f32.mrf.mxu1 }
 0x23f   : > { %736 = vst [vmem:[#allocation2] sm:$0xff] %v732_v43  ;;  %v733_v46 = vadd.f32 %v726_v44, %v588_v42  ;;  %742 = sbr.rel (%p879_p7) target bundleno = 588 (0x24c), region = 52 }
 0x240   : > { %v728_v47 = vpop.f32.mrf.mxu1 }
 0x241   : > { %737 = vst [vmem:[#allocation2 + $0x18] sm:$0xff] %v733_v46  ;;  %v734_v48 = vadd.f32 %v728_v47, %v589_v45 }
 0x243   : > { %738 = vst [vmem:[#allocation2 + $0x8] sm:$0xff] %v734_v48 }
 0x244   : > { %v743_v49 = vld [vmem:[#allocation2 + $0x10] sm:$0xff] }
 0x245   : > { %747 = vst [vmem:[#allocation9] sm:$0xff] %v743_v49 }
 0x246   : > { %v744_v50 = vld [vmem:[#allocation2] sm:$0xff] }
 0x247   : > { %748 = vst [vmem:[#allocation9 + $0x8] sm:$0xff] %v744_v50 }
 0x248   : > { %v745_v51 = vld [vmem:[#allocation2 + $0x18] sm:$0xff] }
 0x249   : > { %749 = vst [vmem:[#allocation9 + $0x10] sm:$0xff] %v745_v51 }
 0x24a   : > { %v746_v52 = vld [vmem:[#allocation2 + $0x8] sm:$0xff] }
 0x24b   : > { %750 = vst [vmem:[#allocation9 + $0x18] sm:$0xff] %v746_v52 }
 0x24c PF: > { %p977_p2 = scmp.eq.s32.totalorder %s1317_s20, 2  ;;  %s1228_s21 = smov [#allocation9]  }
 0x24d   : > { %s761_s6 = sshll.u32 %s1228_s21, 4  ;;  %s762_s6 = int_to_ptr.vmem [resolvable:$true] %s761_s6 }
 0x24e   : > { %s1135_s8 = scalar_lea.vmem %s762_s6, 512  ;;  %p1142_p9 = scmp.lt.s32.totalorder %s762_s6, %s762_s6 }
 0x24f   : > { %p1136_p5 = scmp.ne.s32.totalorder %s762_s6, %s1135_s8  ;;  %p1143_p11 = scmp.lt.s32.totalorder %s1135_s8, %s1135_s8 }
 0x251   : > { %p1137_p8 = pnand %p1136_p5, %p977_p2  ;;  %p1144_p12 = por %p1143_p11, %p1142_p9 }
 0x253   : > { %p1138_p10 = pneg %p1137_p8 }
 0x255   : > { %p1145_p13 = pnand %p1144_p12, %p1138_p10 }
 0x257   : > { %1148 = shalt.err (!%p1145_p13)
}
 0x258   : > { %s1229_s15 = smov 256   ;;  %s1230_s9 = smov 16  }
 0x259   : > { %960 = dma.vmem_to_hbm [thread:$0]  (%p977_p2), %s762_s6, 512, %s1617_s3, [#allocation5], %s1229_s15, %s1229_s15, %s1230_s9  }
 0x25a   : > { %1192 = dma.done.wait (%p977_p2), [#allocation5], 512  }
 0x25b   : > { %1194 = vsyncadd (%p977_p2), [#allocation5], 4294966784 }
 0x25c PF: > { %s18_s17 = sadd.s32 1, %s1217_s17   ;;  %s1622_s12 = smov %s1201_s13 }
 0x25d   : > { %p15_p0 = scmp.ge.s32.totalorder %s18_s17, 5   ;;  %s1623_s13 = smov %s1205_s14 }
 0x25e   : > { %s1624_s14 = smov %s1295_s24  ;;  %s1625_s15 = smov %s1213_s16 }
 0x25f   : > { %s1626_s16 = smov %s1628_s18  ;;  %17 = sbr.rel (!%p15_p0) target bundleno = 6 (0x6), region = 95 }
 0x264   :  { %777 = vsyncpa [#allocation4], 1 }
 0x265   :  { %779 = vsyncpa [#allocation4 + $0x1], 1 }
 0x266   :  { %780 = vsyncpa [#allocation7], 1 }
 0x267   :  { %782 = vsyncpa [#allocation7 + $0x1], 1 }
 0x268   :  { %783 = vsyncpa [#allocation5], 1 }
 0x269   :  { %785 = vsyncpa [#allocation5 + $0x1], 1 }

</bundles_post_ra>
